<compile_context>
chip_gen: v5e
topology: v5e:2x2
jax: 0.10.0
libtpu: 0.0.40
codegen_flags: <defaults>
</compile_context>

<pallas_src>
import functools

import jax
import jax.numpy as jnp
from jax.experimental import pallas as pl
from jax.experimental.pallas import tpu as pltpu

LANE = 128  # pad feature dims to lane-dense multiples of 128


def _mlp_kernel(x_ref, w1_ref, b1_ref, w2_ref, b2_ref, w3_ref, b3_ref, o_ref):
    # Fused Linear -> ReLU -> Linear -> ReLU -> Linear on one batch tile.
    # bf16 operands on the MXU, f32 accumulation, f32 lane-dense store.
    x = x_ref[...]
    h1 = jnp.dot(x, w1_ref[...], preferred_element_type=jnp.float32) + b1_ref[...]
    h1 = jnp.maximum(h1, 0.0).astype(jnp.bfloat16)
    h2 = jnp.dot(h1, w2_ref[...], preferred_element_type=jnp.float32) + b2_ref[...]
    h2 = jnp.maximum(h2, 0.0).astype(jnp.bfloat16)
    o_ref[...] = (jnp.dot(h2, w3_ref[...], preferred_element_type=jnp.float32)
                  + b3_ref[...]).astype(o_ref.dtype)


def _pad_to(n, m):
    return ((n + m - 1) // m) * m


def pack_params(params):
    """Pad feature dims to 128-lane multiples, cast weights to bf16 (biases stay f32).

    Done once, outside the hot path.
    """
    w1, b1, w2, b2, w3, b3 = params
    in_dim, hidden = w1.shape
    out_dim = w3.shape[1]
    in_pad = _pad_to(in_dim, LANE)
    out_pad = _pad_to(out_dim, LANE)

    w1p = jnp.zeros((in_pad, hidden), jnp.bfloat16).at[:in_dim, :].set(w1.astype(jnp.bfloat16))
    w2p = w2.astype(jnp.bfloat16)
    w3p = jnp.zeros((hidden, out_pad), jnp.bfloat16).at[:, :out_dim].set(w3.astype(jnp.bfloat16))
    b1p = b1.astype(jnp.float32)
    b2p = b2.astype(jnp.float32)
    b3p = jnp.zeros((1, out_pad), jnp.float32).at[:, :out_dim].set(b3.astype(jnp.float32))
    return (w1p, b1p, w2p, b2p, w3p, b3p), in_dim, out_dim


@functools.partial(jax.jit, static_argnames=("out_dim", "block_b"))
def dynamics_forward(x, packed, out_dim, block_b=32):
    """Pallas implementation of DynamicsModel.forward (the nn.Sequential MLP)."""
    w1, b1, w2, b2, w3, b3 = packed
    B, in_dim = x.shape
    in_pad, hidden = w1.shape
    out_pad = w3.shape[1]

    # Pad batch to a multiple of the tile, pad features to 128 lanes, cast to bf16.
    b_pad = _pad_to(max(B, block_b), block_b)
    xp = jnp.zeros((b_pad, in_pad), jnp.bfloat16).at[:B, :in_dim].set(x.astype(jnp.bfloat16))

    grid = (b_pad // block_b,)
    cost = pl.CostEstimate(
        flops=2 * b_pad * (in_pad * hidden + hidden * hidden + hidden * out_pad),
        transcendentals=0,
        bytes_accessed=(xp.size * 2
                        + (w1.size + w2.size + w3.size) * 2
                        + (b1.size + b2.size + b3.size) * 4
                        + b_pad * out_pad * 4),
    )

    out_padded = pl.pallas_call(
        _mlp_kernel,
        out_shape=jax.ShapeDtypeStruct((b_pad, out_pad), jnp.float32),
        grid=grid,
        in_specs=[
            pl.BlockSpec((block_b, in_pad), lambda i: (i, 0)),   # pipelined x tile
            pl.BlockSpec((in_pad, hidden), lambda i: (0, 0)),    # resident weights / biases
            pl.BlockSpec((1, hidden), lambda i: (0, 0)),
            pl.BlockSpec((hidden, hidden), lambda i: (0, 0)),
            pl.BlockSpec((1, hidden), lambda i: (0, 0)),
            pl.BlockSpec((hidden, out_pad), lambda i: (0, 0)),
            pl.BlockSpec((1, out_pad), lambda i: (0, 0)),
        ],
        out_specs=pl.BlockSpec((block_b, out_pad), lambda i: (i, 0)),
        compiler_params=pltpu.CompilerParams(
            dimension_semantics=("parallel",)),                  # megacore on v7x
        cost_estimate=cost,
    )(xp, w1, b1, w2, b2, w3, b3)

    # Slice off batch / lane padding.
    return out_padded[:B, :out_dim]


def init_params(key, state_dim, action_dim, hidden=256):
    """Deterministic init mimicking PyTorch nn.Linear default (U[-1/sqrt(fan_in), ...])."""
    in_dim = state_dim + action_dim
    dims = [(in_dim, hidden), (hidden, hidden), (hidden, state_dim)]
    params = []
    for (fan_in, fan_out) in dims:
        key, kw, kb = jax.random.split(key, 3)
        bound = 1.0 / jnp.sqrt(jnp.float32(fan_in))
        w = jax.random.uniform(kw, (fan_in, fan_out), jnp.float32, -bound, bound)
        b = jax.random.uniform(kb, (1, fan_out), jnp.float32, -bound, bound)
        params += [w, b]
    return tuple(params)


def reference_forward(x, params):
    w1, b1, w2, b2, w3, b3 = params
    h1 = jnp.maximum(x @ w1 + b1, 0.0)
    h2 = jnp.maximum(h1 @ w2 + b2, 0.0)
    return h2 @ w3 + b3


if __name__ == "__main__":
    state_dim, action_dim, batch = 8, 4, 64

    key = jax.random.PRNGKey(0)
    key, kx = jax.random.split(key)
    params = init_params(key, state_dim, action_dim)
    packed, in_dim, out_dim = pack_params(params)

    # forward(x) takes the concatenated (state, action) features: (batch, state_dim + action_dim)
    x = jax.random.normal(kx, (batch, state_dim + action_dim), jnp.float32)

    out = dynamics_forward(x, packed, out_dim=out_dim, block_b=32)
    out = jax.block_until_ready(out)

    ref = reference_forward(x, params)
    assert out.shape == (batch, state_dim), out.shape
    # bf16 weights/activations with f32 accumulation -> loosened tolerance vs f32 reference.
    assert jnp.allclose(out, ref, atol=5e-2, rtol=5e-2), (
        "mismatch vs reference, max abs err = %f" % float(jnp.max(jnp.abs(out - ref))))

    # TODO(synk): forward_np / normalize_state_action / denormalize_state are NumPy host-side
    # wrappers around forward(); only the MLP hot path runs in the kernel.
    print("KERNEL_OK")
</pallas_src>

<mosaic_0001>
module attributes {stable_mosaic.version = 11 : i64} {
  func.func @_mlp_kernel(%arg0: i32, %arg1: memref<32x128xbf16, #tpu.memory_space<vmem>>, %arg2: memref<128x256xbf16, #tpu.memory_space<vmem>>, %arg3: memref<1x256xf32, #tpu.memory_space<vmem>>, %arg4: memref<256x256xbf16, #tpu.memory_space<vmem>>, %arg5: memref<1x256xf32, #tpu.memory_space<vmem>>, %arg6: memref<256x128xbf16, #tpu.memory_space<vmem>>, %arg7: memref<1x128xf32, #tpu.memory_space<vmem>>, %arg8: memref<32x128xf32, #tpu.memory_space<vmem>>) attributes {dimension_semantics = [#tpu.dimension_semantics<parallel>], iteration_bounds = array<i64: 2>, scalar_prefetch = 0 : i64, scratch_operands = 0 : i64, tpu.core_type = #tpu.core_type<tc>, window_params = [{transform_indices = @transform_0, window_bounds = array<i64: 32, 128>}, {pipeline_mode = #tpu.pipeline_mode<synchronous>, transform_indices = @transform_1, window_bounds = array<i64: 128, 256>}, {pipeline_mode = #tpu.pipeline_mode<synchronous>, transform_indices = @transform_2, window_bounds = array<i64: 1, 256>}, {pipeline_mode = #tpu.pipeline_mode<synchronous>, transform_indices = @transform_3, window_bounds = array<i64: 256, 256>}, {pipeline_mode = #tpu.pipeline_mode<synchronous>, transform_indices = @transform_4, window_bounds = array<i64: 1, 256>}, {pipeline_mode = #tpu.pipeline_mode<synchronous>, transform_indices = @transform_5, window_bounds = array<i64: 256, 128>}, {pipeline_mode = #tpu.pipeline_mode<synchronous>, transform_indices = @transform_6, window_bounds = array<i64: 1, 128>}, {transform_indices = @transform_7, window_bounds = array<i64: 32, 128>}]} {
    %c0 = arith.constant 0 : index
    %c0_0 = arith.constant 0 : index
    %0 = vector.load %arg1[%c0, %c0_0] : memref<32x128xbf16, #tpu.memory_space<vmem>>, vector<32x128xbf16>
    %c0_1 = arith.constant 0 : index
    %c0_2 = arith.constant 0 : index
    %1 = vector.load %arg2[%c0_1, %c0_2] : memref<128x256xbf16, #tpu.memory_space<vmem>>, vector<128x256xbf16>
    %cst = arith.constant dense<0.000000e+00> : vector<32x256xf32>
    %2 = tpu.matmul %0, %1, %cst {dimension_numbers = #tpu.dot_dimension_numbers<[1], [0], [0], [1], [0, 0, 1, 1], [], []>} : vector<32x128xbf16>, vector<128x256xbf16>, vector<32x256xf32> -> vector<32x256xf32>
    %c0_3 = arith.constant 0 : index
    %c0_4 = arith.constant 0 : index
    %3 = vector.load %arg3[%c0_3, %c0_4] : memref<1x256xf32, #tpu.memory_space<vmem>>, vector<1x256xf32>
    %4 = vector.broadcast %3 : vector<1x256xf32> to vector<32x256xf32>
    %5 = arith.addf %2, %4 : vector<32x256xf32>
    %cst_5 = arith.constant 0.000000e+00 : f32
    %6 = vector.broadcast %cst_5 : f32 to vector<32x256xf32>
    %7 = arith.maximumf %5, %6 : vector<32x256xf32>
    %8 = arith.truncf %7 : vector<32x256xf32> to vector<32x256xbf16>
    %c0_6 = arith.constant 0 : index
    %c0_7 = arith.constant 0 : index
    %9 = vector.load %arg4[%c0_6, %c0_7] : memref<256x256xbf16, #tpu.memory_space<vmem>>, vector<256x256xbf16>
    %cst_8 = arith.constant dense<0.000000e+00> : vector<32x256xf32>
    %10 = tpu.matmul %8, %9, %cst_8 {dimension_numbers = #tpu.dot_dimension_numbers<[1], [0], [0], [1], [0, 0, 1, 1], [], []>} : vector<32x256xbf16>, vector<256x256xbf16>, vector<32x256xf32> -> vector<32x256xf32>
    %c0_9 = arith.constant 0 : index
    %c0_10 = arith.constant 0 : index
    %11 = vector.load %arg5[%c0_9, %c0_10] : memref<1x256xf32, #tpu.memory_space<vmem>>, vector<1x256xf32>
    %12 = vector.broadcast %11 : vector<1x256xf32> to vector<32x256xf32>
    %13 = arith.addf %10, %12 : vector<32x256xf32>
    %cst_11 = arith.constant 0.000000e+00 : f32
    %14 = vector.broadcast %cst_11 : f32 to vector<32x256xf32>
    %15 = arith.maximumf %13, %14 : vector<32x256xf32>
    %16 = arith.truncf %15 : vector<32x256xf32> to vector<32x256xbf16>
    %c0_12 = arith.constant 0 : index
    %c0_13 = arith.constant 0 : index
    %17 = vector.load %arg6[%c0_12, %c0_13] : memref<256x128xbf16, #tpu.memory_space<vmem>>, vector<256x128xbf16>
    %cst_14 = arith.constant dense<0.000000e+00> : vector<32x128xf32>
    %18 = tpu.matmul %16, %17, %cst_14 {dimension_numbers = #tpu.dot_dimension_numbers<[1], [0], [0], [1], [0, 0, 1, 1], [], []>} : vector<32x256xbf16>, vector<256x128xbf16>, vector<32x128xf32> -> vector<32x128xf32>
    %c0_15 = arith.constant 0 : index
    %c0_16 = arith.constant 0 : index
    %19 = vector.load %arg7[%c0_15, %c0_16] : memref<1x128xf32, #tpu.memory_space<vmem>>, vector<1x128xf32>
    %20 = vector.broadcast %19 : vector<1x128xf32> to vector<32x128xf32>
    %21 = arith.addf %18, %20 : vector<32x128xf32>
    %c0_17 = arith.constant 0 : index
    %c0_18 = arith.constant 0 : index
    %22 = vector.load %arg8[%c0_17, %c0_18] : memref<32x128xf32, #tpu.memory_space<vmem>>, vector<32x128xf32>
    tpu.vector_store %arg8[%c0_17, %c0_18], %21 {strides = array<i32>} : memref<32x128xf32, #tpu.memory_space<vmem>>, vector<32x128xf32>,
    return
  }
  func.func @transform_0(%arg0: i32) -> (i32, i32) {
    %c0_i32 = arith.constant 0 : i32
    %c0_i32_0 = arith.constant 0 : i32
    return %arg0, %c0_i32 : i32, i32
  }
  func.func @transform_1(%arg0: i32) -> (i32, i32) {
    %c0_i32 = arith.constant 0 : i32
    %c0_i32_0 = arith.constant 0 : i32
    %c0_i32_1 = arith.constant 0 : i32
    return %c0_i32, %c0_i32_0 : i32, i32
  }
  func.func @transform_2(%arg0: i32) -> (i32, i32) {
    %c0_i32 = arith.constant 0 : i32
    %c0_i32_0 = arith.constant 0 : i32
    %c0_i32_1 = arith.constant 0 : i32
    return %c0_i32, %c0_i32_0 : i32, i32
  }
  func.func @transform_3(%arg0: i32) -> (i32, i32) {
    %c0_i32 = arith.constant 0 : i32
    %c0_i32_0 = arith.constant 0 : i32
    %c0_i32_1 = arith.constant 0 : i32
    return %c0_i32, %c0_i32_0 : i32, i32
  }
  func.func @transform_4(%arg0: i32) -> (i32, i32) {
    %c0_i32 = arith.constant 0 : i32
    %c0_i32_0 = arith.constant 0 : i32
    %c0_i32_1 = arith.constant 0 : i32
    return %c0_i32, %c0_i32_0 : i32, i32
  }
  func.func @transform_5(%arg0: i32) -> (i32, i32) {
    %c0_i32 = arith.constant 0 : i32
    %c0_i32_0 = arith.constant 0 : i32
    %c0_i32_1 = arith.constant 0 : i32
    return %c0_i32, %c0_i32_0 : i32, i32
  }
  func.func @transform_6(%arg0: i32) -> (i32, i32) {
    %c0_i32 = arith.constant 0 : i32
    %c0_i32_0 = arith.constant 0 : i32
    %c0_i32_1 = arith.constant 0 : i32
    return %c0_i32, %c0_i32_0 : i32, i32
  }
  func.func @transform_7(%arg0: i32) -> (i32, i32) {
    %c0_i32 = arith.constant 0 : i32
    %c0_i32_0 = arith.constant 0 : i32
    return %arg0, %c0_i32 : i32, i32
  }
}

</mosaic_0001>

<bundles_post_ra>
// kernel: dynamics_forward.1
= control target key start
LH: loop header
LB: loop body
LE: loop exit
PB: predicated region body
PF: predicated region fallthrough
CT: control target
= control target key end

     0   :  { %12 = vsyncpa [#allocation3], 0  ;;  %s1687_s0 = inlined_call_operand.vmem [shape: bf16[64,128], index: 0, kind: input, shape index: {}]   ;;  %s1688_s1 = inlined_call_operand.vmem [shape: bf16[128,256], index: 1, kind: input, shape index: {}]   ;;  %s1689_s2 = inlined_call_operand.vmem [shape: f32[1,256], index: 2, kind: input, shape index: {}]   ;;  %s1690_s3 = inlined_call_operand.hbm [shape: bf16[256,256], index: 3, kind: input, shape index: {}]   ;;  %s1691_s4 = inlined_call_operand.vmem [shape: f32[1,256], index: 4, kind: input, shape index: {}]   ;;  %s1692_s5 = inlined_call_operand.hbm [shape: bf16[256,128], index: 5, kind: input, shape index: {}]   ;;  %s1693_s6 = inlined_call_operand.vmem [shape: f32[1,128], index: 6, kind: input, shape index: {}]   ;;  %s1694_s7 = inlined_call_operand.vmem [shape: f32[64,128], index: 7, kind: output, shape index: {}]  }
   0x1   :  { %13 = vsyncpa [#allocation5], 0  ;;  %s1523_s24 = smov 0  }
   0x2 LB: > { %s219_s27 = sshll.u32 %s1690_s3, 4  ;;  %s1022_s28 = sadd.s32 4294967295, %s1475_s24   ;;  %s1475_s24 = sphi %s1523_s24, %s19_s24   ;;  %s220_s27 = int_to_ptr.hbm [resolvable:$true] %s219_s27 }
   0x3   : > { %p1024_p0 = scmp.ge.s32.totalorder %s1475_s24, 1  ;;  %p202_p1 = scmp.lt.s32.totalorder %s1475_s24, 3 }
   0x4   : > { %p1536_p2 = scmp.eq.s32.totalorder %s1022_s28, 0  ;;  %s1477_s8 = smov [#allocation2]  }
   0x5   : > { %p1540_p3 = pnand %p1024_p0, %p202_p1  ;;  %s221_s9 = sshll.u32 %s1477_s8, 4  ;;  %s222_s9 = int_to_ptr.vmem [resolvable:$true] %s221_s9 }
   0x6   : > { %s236_s12 = sshll.u32 %s1692_s5, 4  ;;  %s1478_s13 = smov [#allocation4]   ;;  %s237_s12 = int_to_ptr.hbm [resolvable:$true] %s236_s12 }
   0x7   : > { %p1375_p4 = pneg %p1540_p3  ;;  %s238_s14 = sshll.u32 %s1478_s13, 4  ;;  %s239_s14 = int_to_ptr.vmem [resolvable:$true] %s238_s14 }
   0x8   : > { %s1479_s15 = smov 128   ;;  %s1480_s16 = smov 8  }
   0x9   : > { %p1376_p5 = pnand %p1536_p2, %p1375_p4  ;;  %s1481_s17 = smov 64  }
   0xa   : > { %s1482_s18 = smov 4   ;;  %266 = sbr.rel (%p1540_p3) target bundleno = 501 (0x1f5), region = 48 }
   0xb   : > { %1378 = dma.hbm_to_vmem [thread:$0]  (!%p1376_p5), %s220_s27, 4096, %s222_s9, [#allocation3], %s1479_s15, %s1479_s15, %s1480_s16  }
   0xc   : > { %1381 = dma.hbm_to_vmem [thread:$0]  (!%p1376_p5), %s237_s12, 2048, %s239_s14, [#allocation5], %s1481_s17, %s1481_s17, %s1482_s18  }
   0xf   : > { %1466 = dma.done.wait (%p1536_p2), [#allocation3], 4096  }
  0x10   : > { %1468 = vsyncadd (%p1536_p2), [#allocation3], 4294963200 }
  0x11   : > { %1470 = dma.done.wait (%p1536_p2), [#allocation5], 2048  }
  0x12   : > { %1472 = vsyncadd (%p1536_p2), [#allocation5], 4294965248  ;;  %v1101_v0 = vld [vmem:[%s1688_s1 + $0x70] sm:$0xf]  ;;  %v1318_v1 = vld [vmem:[%s1688_s1 + $0x74] sm:$0xf0] }
  0x13   : > { %v1317_v2 = vld [vmem:[%s1688_s1 + $0x74] sm:$0xf]  ;;  %v1102_v3 = vor.u32 %v1318_v1, %v1101_v0  ;;  %v1103_v4 = vld [vmem:[%s1688_s1 + $0x78] sm:$0xf0]  ;;  %v1093_v5 = vld [vmem:[%s1688_s1 + $0x60] sm:$0xf] }
  0x14   : > { %v1316_v6 = vld [vmem:[%s1688_s1 + $0x64] sm:$0xf0]  ;;  %v1106_v7 = vor.u32 %v1317_v2, %v1103_v4  ;;  %v1315_v8 = vld [vmem:[%s1688_s1 + $0x64] sm:$0xf]  ;;  %v1095_v9 = vld [vmem:[%s1688_s1 + $0x68] sm:$0xf0] }
  0x15   : > { %434 = vmatpush.bf16.msra.mxu0 %v1102_v3  ;;  %v1094_v10 = vor.u32 %v1316_v6, %v1093_v5  ;;  %v1098_v11 = vor.u32 %v1315_v8, %v1095_v9  ;;  %v1085_v12 = vld [vmem:[%s1688_s1 + $0x50] sm:$0xf]  ;;  %v1314_v13 = vld [vmem:[%s1688_s1 + $0x54] sm:$0xf0]  ;;  %v1313_v14 = vld [vmem:[%s1688_s1 + $0x54] sm:$0xf] }
  0x16   : > { %453 = vmatpush.bf16.msra.mxu1 %v1106_v7  ;;  %v1087_v15 = vld [vmem:[%s1688_s1 + $0x58] sm:$0xf0]  ;;  %v1086_v16 = vor.u32 %v1314_v13, %v1085_v12  ;;  %s1031_s22 = sshll.u32 %s1022_s28, 2  ;;  %v1077_v18 = vld [vmem:[%s1688_s1 + $0x40] sm:$0xf] }
  0x17   : > { %v1090_v17 = vor.u32 %v1313_v14, %v1087_v15  ;;  %v1312_v19 = vld [vmem:[%s1688_s1 + $0x44] sm:$0xf0]  ;;  %v1311_v20 = vld [vmem:[%s1688_s1 + $0x44] sm:$0xf]  ;;  %v1079_v21 = vld [vmem:[%s1688_s1 + $0x48] sm:$0xf0] }
  0x18   : > { %p305_p6 = scmp.lt.s32.totalorder %s1031_s22, 7  ;;  %v1078_v22 = vor.u32 %v1312_v19, %v1077_v18  ;;  %v1082_v23 = vor.u32 %v1311_v20, %v1079_v21  ;;  %v1069_v24 = vld [vmem:[%s1688_s1 + $0x30] sm:$0xf]  ;;  %v1310_v25 = vld [vmem:[%s1688_s1 + $0x34] sm:$0xf0] }
  0x19   : > { %435 = vmatpush.bf16.msra.mxu0 %v1094_v10  ;;  %v1309_v26 = vld [vmem:[%s1688_s1 + $0x34] sm:$0xf]  ;;  %v1071_v27 = vld [vmem:[%s1688_s1 + $0x38] sm:$0xf0]  ;;  %v1070_v28 = vor.u32 %v1310_v25, %v1069_v24  ;;  %v1061_v30 = vld [vmem:[%s1688_s1 + $0x20] sm:$0xf] }
  0x1a   : > { %454 = vmatpush.bf16.msra.mxu1 %v1098_v11  ;;  %s1698_s22 = smov (!%p305_p6, %s1031_s22), 7  ;;  %v1074_v29 = vor.u32 %v1309_v26, %v1071_v27  ;;  %v1308_v31 = vld [vmem:[%s1688_s1 + $0x24] sm:$0xf0]  ;;  %v1307_v32 = vld [vmem:[%s1688_s1 + $0x24] sm:$0xf] }
  0x1b   : > { %v1063_v33 = vld [vmem:[%s1688_s1 + $0x28] sm:$0xf0]  ;;  %s1032_s27 = sshll.u32 %s1698_s22, 2  ;;  %v1062_v34 = vor.u32 %v1308_v31, %v1061_v30  ;;  %v1165_v35 = vld [vmem:[#allocation2 + $0x70] sm:$0xf]  ;;  %s1034_s28 = sshll.u32 %s1698_s22, 3 }
  0x1c   : > { %v1334_v36 = vld [vmem:[#allocation2 + $0x74] sm:$0xf0]  ;;  %v1229_v37 = vld [vmem:[#allocation2 + $0xf0] sm:$0xf]  ;;  %v1066_v38 = vor.u32 %v1307_v32, %v1063_v33  ;;  %v1305_v43 = vld [vmem:[%s1688_s1 + $0x14] sm:$0xf]  ;;  %s1667_s25 = scalar_lea.vmem %s1687_s0, %s1032_s27  ;;  %s314_s12 = scalar_lea.vmem %s1694_s7, %s1034_s28 }
  0x1d   : > { %436 = vmatpush.bf16.msra.mxu0 %v1086_v16  ;;  %v1053_v39 = vld [vmem:[%s1688_s1 + $0x10] sm:$0xf]  ;;  %v1306_v40 = vld [vmem:[%s1688_s1 + $0x14] sm:$0xf0]  ;;  %v1166_v41 = vor.u32 %v1334_v36, %v1165_v35  ;;  %v1055_v44 = vld [vmem:[%s1688_s1 + $0x18] sm:$0xf0] }
  0x1e   : > { %455 = vmatpush.bf16.msra.mxu1 %v1090_v17  ;;  %v1350_v42 = vld [vmem:[#allocation2 + $0xf4] sm:$0xf0]  ;;  %v1157_v46 = vld [vmem:[#allocation2 + $0x60] sm:$0xf]  ;;  %v1332_v48 = vld [vmem:[#allocation2 + $0x64] sm:$0xf0]  ;;  %v1054_v51 = vor.u32 %v1306_v40, %v1053_v39  ;;  %v1058_v57 = vor.u32 %v1305_v43, %v1055_v44 }
  0x1f   : > { %v1230_v45 = vor.u32 %v1350_v42, %v1229_v37  ;;  %v1045_v47 = vld [vmem:[%s1688_s1] sm:$0xf]  ;;  %682 = vmatpush.bf16.msra.mxu2 %v1166_v41  ;;  %v1348_v50 = vld [vmem:[#allocation2 + $0xe4] sm:$0xf0]  ;;  %v1303_v53 = vld [vmem:[%s1688_s1 + $0x4] sm:$0xf]  ;;  %v1158_v55 = vor.u32 %v1332_v48, %v1157_v46 }
  0x20   : > { %v1221_v49 = vld [vmem:[#allocation2 + $0xe0] sm:$0xf]  ;;  %v1304_v52 = vld [vmem:[%s1688_s1 + $0x4] sm:$0xf0]  ;;  %v1047_v54 = vld [vmem:[%s1688_s1 + $0x8] sm:$0xf0] }
  0x21   : > { %437 = vmatpush.bf16.msra.mxu0 %v1078_v22  ;;  %701 = vmatpush.bf16.msra.mxu3 %v1230_v45  ;;  %v1222_v56 = vor.u32 %v1348_v50, %v1221_v49  ;;  %v1333_v58 = vld [vmem:[#allocation2 + $0x74] sm:$0xf]  ;;  %v1149_v59 = vld [vmem:[#allocation2 + $0x50] sm:$0xf]  ;;  %v1330_v60 = vld [vmem:[#allocation2 + $0x54] sm:$0xf0]  ;;  %v1046_v3 = vor.u32 %v1304_v52, %v1045_v47  ;;  %v1050_v7 = vor.u32 %v1303_v53, %v1047_v54 }
  0x22   : > { %456 = vmatpush.bf16.msra.mxu1 %v1082_v23  ;;  %v1167_v61 = vld [vmem:[#allocation2 + $0x78] sm:$0xf0]  ;;  %v1213_v62 = vld [vmem:[#allocation2 + $0xd0] sm:$0xf]  ;;  %v1346_v63 = vld [vmem:[#allocation2 + $0xd4] sm:$0xf0]  ;;  %v1150_v2 = vor.u32 %v1330_v60, %v1149_v59 }
  0x23   : > { %v1349_v0 = vld [vmem:[#allocation2 + $0xf4] sm:$0xf]  ;;  %v1231_v1 = vld [vmem:[#allocation2 + $0xf8] sm:$0xf0]  ;;  %683 = vmatpush.bf16.msra.mxu2 %v1158_v55  ;;  %v1214_v4 = vor.u32 %v1346_v63, %v1213_v62  ;;  %v1141_v5 = vld [vmem:[#allocation2 + $0x40] sm:$0xf]  ;;  %v1170_v8 = vor.u32 %v1333_v58, %v1167_v61 }
  0x24   : > { %v1328_v6 = vld [vmem:[#allocation2 + $0x44] sm:$0xf0]  ;;  %v1205_v9 = vld [vmem:[#allocation2 + $0xc0] sm:$0xf]  ;;  %v1234_v11 = vor.u32 %v1349_v0, %v1231_v1  ;;  %v1331_v12 = vld [vmem:[#allocation2 + $0x64] sm:$0xf] }
  0x25   : > { %438 = vmatpush.bf16.msra.mxu0 %v1070_v28  ;;  %702 = vmatpush.bf16.msra.mxu3 %v1222_v56  ;;  %v1344_v10 = vld [vmem:[#allocation2 + $0xc4] sm:$0xf0]  ;;  %v1159_v13 = vld [vmem:[#allocation2 + $0x68] sm:$0xf0]  ;;  %v1301_v14 = vld [vmem:[%s1667_s25] sm:$0xff]  ;;  %v1142_v17 = vor.u32 %v1328_v6, %v1141_v5 }
  0x26   : > { %457 = vmatpush.bf16.msra.mxu1 %v1074_v29  ;;  %v1347_v15 = vld [vmem:[#allocation2 + $0xe4] sm:$0xf]  ;;  %v1223_v16 = vld [vmem:[#allocation2 + $0xe8] sm:$0xf0]  ;;  %v1206_v18 = vor.u32 %v1344_v10, %v1205_v9  ;;  %v1162_v19 = vor.u32 %v1331_v12, %v1159_v13  ;;  %v1329_v21 = vld [vmem:[#allocation2 + $0x54] sm:$0xf] }
  0x27   : > { %684 = vmatpush.bf16.msra.mxu2 %v1150_v2  ;;  %v1226_v20 = vor.u32 %v1347_v15, %v1223_v16  ;;  %v1151_v22 = vld [vmem:[#allocation2 + $0x58] sm:$0xf0]  ;;  %v1345_v23 = vld [vmem:[#allocation2 + $0xd4] sm:$0xf]  ;;  %v1327_v27 = vld [vmem:[#allocation2 + $0x44] sm:$0xf] }
  0x28   : > { %v1215_v24 = vld [vmem:[#allocation2 + $0xd8] sm:$0xf0]  ;;  %v1154_v25 = vor.u32 %v1329_v21, %v1151_v22  ;;  %v1143_v28 = vld [vmem:[#allocation2 + $0x48] sm:$0xf0]  ;;  %v1343_v29 = vld [vmem:[#allocation2 + $0xc4] sm:$0xf] }
  0x29   : > { %439 = vmatpush.bf16.msra.mxu0 %v1062_v34  ;;  %703 = vmatpush.bf16.msra.mxu3 %v1214_v4  ;;  %v1218_v26 = vor.u32 %v1345_v23, %v1215_v24  ;;  %v1207_v30 = vld [vmem:[#allocation2 + $0xc8] sm:$0xf0]  ;;  %v1146_v31 = vor.u32 %v1327_v27, %v1143_v28  ;;  %v1133_v34 = vld [vmem:[#allocation2 + $0x30] sm:$0xf]  ;;  %v1326_v35 = vld [vmem:[#allocation2 + $0x34] sm:$0xf0] }
  0x2a   : > { %458 = vmatpush.bf16.msra.mxu1 %v1066_v38  ;;  %v1210_v32 = vor.u32 %v1343_v29, %v1207_v30  ;;  %v1302_v33 = vld [vmem:[%s1667_s25 + $0x8] sm:$0xff]  ;;  %v1197_v36 = vld [vmem:[#allocation2 + $0xb0] sm:$0xf]  ;;  %v1134_v37 = vor.u32 %v1326_v35, %v1133_v34  ;;  %v1342_v38 = vld [vmem:[#allocation2 + $0xb4] sm:$0xf0] }
  0x2b   : > { %685 = vmatpush.bf16.msra.mxu2 %v1142_v17  ;;  %v1325_v39 = vld [vmem:[#allocation2 + $0x34] sm:$0xf]  ;;  %v1135_v40 = vld [vmem:[#allocation2 + $0x38] sm:$0xf0]  ;;  %v1198_v41 = vor.u32 %v1342_v38, %v1197_v36  ;;  %v1125_v46 = vld [vmem:[#allocation2 + $0x20] sm:$0xf] }
  0x2c   : > { %v1138_v42 = vor.u32 %v1325_v39, %v1135_v40  ;;  %v1341_v43 = vld [vmem:[#allocation2 + $0xb4] sm:$0xf]  ;;  %v1199_v44 = vld [vmem:[#allocation2 + $0xb8] sm:$0xf0]  ;;  %v1324_v47 = vld [vmem:[#allocation2 + $0x24] sm:$0xf0] }
  0x2d   : > { %440 = vmatpush.bf16.msra.mxu0 %v1054_v51  ;;  %704 = vmatpush.bf16.msra.mxu3 %v1206_v18  ;;  %v1202_v45 = vor.u32 %v1341_v43, %v1199_v44  ;;  %v1126_v48 = vor.u32 %v1324_v47, %v1125_v46  ;;  %v1189_v49 = vld [vmem:[#allocation2 + $0xa0] sm:$0xf]  ;;  %v1340_v50 = vld [vmem:[#allocation2 + $0xa4] sm:$0xf0]  ;;  %v1323_v51 = vld [vmem:[#allocation2 + $0x24] sm:$0xf] }
  0x2e   : > { %459 = vmatpush.bf16.msra.mxu1 %v1058_v57  ;;  %v1190_v52 = vor.u32 %v1340_v50, %v1189_v49  ;;  %v1127_v53 = vld [vmem:[#allocation2 + $0x28] sm:$0xf0]  ;;  %v1339_v54 = vld [vmem:[#allocation2 + $0xa4] sm:$0xf]  ;;  %v1117_v58 = vld [vmem:[#allocation2 + $0x10] sm:$0xf] }
  0x2f   : > { %686 = vmatpush.bf16.msra.mxu2 %v1134_v37  ;;  %v1191_v55 = vld [vmem:[#allocation2 + $0xa8] sm:$0xf0]  ;;  %v1130_v56 = vor.u32 %v1323_v51, %v1127_v53  ;;  %v1322_v59 = vld [vmem:[#allocation2 + $0x14] sm:$0xf0]  ;;  %v1181_v60 = vld [vmem:[#allocation2 + $0x90] sm:$0xf] }
  0x30   : > { %v1194_v57 = vor.u32 %v1339_v54, %v1191_v55  ;;  %v1118_v61 = vor.u32 %v1322_v59, %v1117_v58  ;;  %v1338_v62 = vld [vmem:[#allocation2 + $0x94] sm:$0xf0]  ;;  %v1321_v63 = vld [vmem:[#allocation2 + $0x14] sm:$0xf]  ;;  %v1119_v0 = vld [vmem:[#allocation2 + $0x18] sm:$0xf0] }
  0x31   : > { %441 = vmatpush.bf16.msra.mxu0 %v1046_v3  ;;  %705 = vmatpush.bf16.msra.mxu3 %v1198_v41  ;;  %v1182_v1 = vor.u32 %v1338_v62, %v1181_v60  ;;  %v1122_v2 = vor.u32 %v1321_v63, %v1119_v0  ;;  %v1337_v3 = vld [vmem:[#allocation2 + $0x94] sm:$0xf]  ;;  %v1183_v4 = vld [vmem:[#allocation2 + $0x98] sm:$0xf0]  ;;  %v1109_v6 = vld [vmem:[#allocation2] sm:$0xf] }
  0x32   : > { %460 = vmatpush.bf16.msra.mxu1 %v1050_v7  ;;  %v1186_v5 = vor.u32 %v1337_v3, %v1183_v4  ;;  %v1320_v7 = vld [vmem:[#allocation2 + $0x4] sm:$0xf0]  ;;  %v1111_v12 = vld [vmem:[#allocation2 + $0x8] sm:$0xf0]  ;;  %v1335_v15 = vld [vmem:[#allocation2 + $0x84] sm:$0xf] }
  0x33   : > { %687 = vmatpush.bf16.msra.mxu2 %v1126_v48  ;;  %v1110_v9 = vor.u32 %v1320_v7, %v1109_v6  ;;  %v1336_v10 = vld [vmem:[#allocation2 + $0x84] sm:$0xf0]  ;;  %v1175_v16 = vld [vmem:[#allocation2 + $0x88] sm:$0xf0]  ;;  %v336_v18 = vld [vmem:[%s1689_s2] sm:$0x3] }
  0x34   : > { %442 = vmatmul.bf16.vlgmr.msra.gmra.mxu0 %v1301_v14  ;;  %v1178_v17 = vor.u32 %v1335_v15, %v1175_v16  ;;  %v1358_v21 = vld [vmem:[#allocation4 + $0x38] sm:$0xff]  ;;  %v1365_v23 = vld [vmem:[#allocation4 + $0x70] sm:$0xff]  ;;  %v1364_v27 = vld [vmem:[#allocation4 + $0x68] sm:$0xff] }
  0x35   : > { %720 = vmatpush.bf16.msrb.mxu0 %v1170_v8  ;;  %461 = vmatmul.bf16.vlgmr.msra.gmra.mxu1 %v1301_v14  ;;  %v1173_v8 = vld [vmem:[#allocation2 + $0x80] sm:$0xf]  ;;  %v1357_v24 = vld [vmem:[#allocation4 + $0x30] sm:$0xff]  ;;  %v1356_v28 = vld [vmem:[#allocation4 + $0x28] sm:$0xff] }
  0x36   : > { %739 = vmatpush.bf16.msrb.mxu1 %v1234_v11  ;;  %706 = vmatpush.bf16.msra.mxu3 %v1190_v52  ;;  %v1319_v11 = vld [vmem:[#allocation2 + $0x4] sm:$0xf]  ;;  %v1174_v13 = vor.u32 %v1336_v10, %v1173_v8  ;;  %v1361_v58 = vld [vmem:[#allocation4 + $0x50] sm:$0xff]  ;;  %v1354_v59 = vld [vmem:[#allocation4 + $0x18] sm:$0xff] }
  0x37   : > { %688 = vmatpush.bf16.msra.mxu2 %v1118_v61  ;;  %v1114_v14 = vor.u32 %v1319_v11, %v1111_v12  ;;  %v1363_v35 = vld [vmem:[#allocation4 + $0x60] sm:$0xff]  ;;  %v1360_v60 = vld [vmem:[#allocation4 + $0x48] sm:$0xff]  ;;  %v1353_v61 = vld [vmem:[#allocation4 + $0x10] sm:$0xff] }
  0x38   : > { %v1359_v62 = vld [vmem:[#allocation4 + $0x40] sm:$0xff]  ;;  %v1352_v63 = vld [vmem:[#allocation4 + $0x8] sm:$0xff] }
  0x39   : > { %721 = vmatpush.bf16.msrb.mxu0 %v1162_v19  ;;  %v1351_v0 = vld [vmem:[#allocation4] sm:$0xff] }
  0x3a   : > { %740 = vmatpush.bf16.msrb.mxu1 %v1226_v20  ;;  %707 = vmatpush.bf16.msra.mxu3 %v1182_v1  ;;  %v1366_v20 = vld [vmem:[#allocation4 + $0x78] sm:$0xff]  ;;  %v516_v1 = vld [vmem:[%s1691_s4] sm:$0x3] }
  0x3b   : > { %689 = vmatpush.bf16.msra.mxu2 %v1110_v9  ;;  %v519_v3 = vperm.slane %v516_v1, 1  ;;  %v518_v7 = vperm.slane %v516_v1, 0 }
  0x3d   : > { %722 = vmatpush.bf16.msrb.mxu0 %v1154_v25  ;;  %v338_v25 = vperm.slane %v336_v18, 0 }
  0x3e   : > { %741 = vmatpush.bf16.msrb.mxu1 %v1218_v26  ;;  %708 = vmatpush.bf16.msra.mxu3 %v1174_v13  ;;  %v339_v26 = vperm.slane %v336_v18, 1 }
  0x3f   : > { %902 = vmatpush.bf16.msrb.mxu2 %v1358_v21 }
  0x41   : > { %723 = vmatpush.bf16.msrb.mxu0 %v1146_v31 }
  0x42   : > { %742 = vmatpush.bf16.msrb.mxu1 %v1210_v32  ;;  %921 = vmatpush.bf16.msrb.mxu3 %v1366_v20 }
  0x43   : > { %903 = vmatpush.bf16.msrb.mxu2 %v1357_v24 }
  0x44   : > { %447 = vmatmul.bf16.gmra.mxu0 %v1302_v33 }
  0x45   : > { %466 = vmatmul.bf16.gmra.mxu1 %v1302_v33  ;;  %724 = vmatpush.bf16.msrb.mxu0 %v1138_v42 }
  0x46   : > { %743 = vmatpush.bf16.msrb.mxu1 %v1202_v45  ;;  %922 = vmatpush.bf16.msrb.mxu3 %v1365_v23 }
  0x47   : > { %904 = vmatpush.bf16.msrb.mxu2 %v1356_v28 }
  0x49   : > { %725 = vmatpush.bf16.msrb.mxu0 %v1130_v56  ;;  %v1362_v56 = vld [vmem:[#allocation4 + $0x58] sm:$0xff] }
  0x4a   : > { %744 = vmatpush.bf16.msrb.mxu1 %v1194_v57  ;;  %923 = vmatpush.bf16.msrb.mxu3 %v1364_v27  ;;  %v1355_v57 = vld [vmem:[#allocation4 + $0x20] sm:$0xff] }
  0x4b   : > { %905 = vmatpush.bf16.msrb.mxu2 %v1355_v57 }
  0x4d   : > { %726 = vmatpush.bf16.msrb.mxu0 %v1122_v2 }
  0x4e   : > { %745 = vmatpush.bf16.msrb.mxu1 %v1186_v5  ;;  %924 = vmatpush.bf16.msrb.mxu3 %v1363_v35 }
  0x4f   : > { %906 = vmatpush.bf16.msrb.mxu2 %v1354_v59 }
  0x51   : > { %727 = vmatpush.bf16.msrb.mxu0 %v1114_v14 }
  0x52   : > { %746 = vmatpush.bf16.msrb.mxu1 %v1178_v17  ;;  %925 = vmatpush.bf16.msrb.mxu3 %v1362_v56 }
  0x53   : > { %907 = vmatpush.bf16.msrb.mxu2 %v1353_v61 }
  0x56   : > { %926 = vmatpush.bf16.msrb.mxu3 %v1361_v58 }
  0x57   : > { %908 = vmatpush.bf16.msrb.mxu2 %v1352_v63 }
  0x5a   : > { %927 = vmatpush.bf16.msrb.mxu3 %v1360_v60 }
  0x5b   : > { %909 = vmatpush.bf16.msrb.mxu2 %v1351_v0 }
  0x5e   : > { %928 = vmatpush.bf16.msrb.mxu3 %v1359_v62 }
  0xb1   : > { %v443_v19 = vpop.f32.mrf.mxu0 }
  0xb2   : > { %v462_v22 = vpop.f32.mrf.mxu1  ;;  %v444_v29 = vadd.f32 %v443_v19, %v338_v25 }
  0xb3   : > { %v463_v30 = vadd.f32 %v462_v22, %v339_v26 }
  0xb4   : > { %v472_v36 = vmax.f32 %v444_v29, 0.0 }
  0xb5   : > { %v473_v38 = vmax.f32 %v463_v30, 0.0 }
  0xb9   : > { %v445_v31 = vpop.f32.mrf.mxu0 }
  0xba   : > { %v446_v32 = vadd.f32 %v445_v31, %v338_v25  ;;  %v464_v33 = vpop.f32.mrf.mxu1 }
  0xbb   : > { %v465_v34 = vadd.f32 %v464_v33, %v339_v26 }
  0xbc   : > { %v474_v37 = vmax.f32 %v446_v32, 0.0 }
  0xbd   : > { %v475_v39 = vmax.f32 %v465_v34, 0.0 }
  0xbe   : > { %v480_v40 = vpack.c.bf16 %v474_v37, %v472_v36 }
  0xbf   : > { %v481_v41 = vpack.c.bf16 %v475_v39, %v473_v38 }
  0xc0   : > { %690 = vmatmul.bf16.vlgmr.msra.gmra.mxu2 %v480_v40  ;;  %728 = vmatmul.bf16.vlgmr.msrb.gmra.mxu0 %v480_v40 }
  0xc1   : > { %709 = vmatmul.bf16.vlgmr.msra.gmra.mxu3 %v481_v41  ;;  %747 = vmatmul.bf16.vlgmr.msrb.gmra.mxu1 %v481_v41  ;;  %v448_v42 = vpop.f32.mrf.mxu0 }
  0xc2   : > { %v467_v43 = vpop.f32.mrf.mxu1  ;;  %v449_v44 = vadd.f32 %v448_v42, %v338_v25 }
  0xc3   : > { %v468_v45 = vadd.f32 %v467_v43, %v339_v26 }
  0xc4   : > { %v476_v50 = vmax.f32 %v449_v44, 0.0 }
  0xc5   : > { %v477_v52 = vmax.f32 %v468_v45, 0.0 }
  0xc9   : > { %v450_v46 = vpop.f32.mrf.mxu0 }
  0xca   : > { %v451_v47 = vadd.f32 %v450_v46, %v338_v25  ;;  %v469_v48 = vpop.f32.mrf.mxu1 }
  0xcb   : > { %v470_v49 = vadd.f32 %v469_v48, %v339_v26 }
  0xcc   : > { %v478_v51 = vmax.f32 %v451_v47, 0.0 }
  0xcd   : > { %v479_v53 = vmax.f32 %v470_v49, 0.0  ;;  %v1400_v49 = vld [vmem:[%s1693_s6] ss:$0 sm:$0xff] }
  0xce   : > { %v482_v54 = vpack.c.bf16 %v478_v51, %v476_v50 }
  0xcf   : > { %v483_v55 = vpack.c.bf16 %v479_v53, %v477_v52 }
  0xd0   : > { %695 = vmatmul.bf16.gmra.mxu2 %v482_v54  ;;  %733 = vmatmul.bf16.gmra.mxu0 %v482_v54 }
  0xd1   : > { %714 = vmatmul.bf16.gmra.mxu3 %v483_v55  ;;  %752 = vmatmul.bf16.gmra.mxu1 %v483_v55 }
 0x13d   : > { %v729_v2 = vpop.f32.mrf.mxu0 }
 0x13e   : > { %v748_v4 = vpop.f32.mrf.mxu1  ;;  %v730_v5 = vadd.f32 %v729_v2, %v519_v3 }
 0x140   : > { %v749_v10 = vadd.f32 %v748_v4, %v730_v5 }
 0x142   : > { %v759_v15 = vmax.f32 %v749_v10, 0.0 }
 0x143   : > { %v691_v6 = vpop.f32.mrf.mxu2 }
 0x144   : > { %v710_v8 = vpop.f32.mrf.mxu3  ;;  %v692_v13 = vadd.f32 %v691_v6, %v518_v7 }
 0x145   : > { %v731_v9 = vpop.f32.mrf.mxu0 }
 0x146   : > { %v732_v11 = vadd.f32 %v731_v9, %v519_v3  ;;  %v750_v12 = vpop.f32.mrf.mxu1  ;;  %v711_v18 = vadd.f32 %v710_v8, %v692_v13 }
 0x148   : > { %v751_v14 = vadd.f32 %v750_v12, %v732_v11  ;;  %v758_v25 = vmax.f32 %v711_v18, 0.0 }
 0x14a   : > { %v761_v16 = vmax.f32 %v751_v14, 0.0 }
 0x14b   : > { %v693_v17 = vpop.f32.mrf.mxu2 }
 0x14c   : > { %v767_v19 = vpack.c.bf16 %v761_v16, %v759_v15  ;;  %v694_v20 = vadd.f32 %v693_v17, %v518_v7  ;;  %v712_v21 = vpop.f32.mrf.mxu3 }
 0x14d   : > { %v734_v22 = vpop.f32.mrf.mxu0 }
 0x14e   : > { %v713_v23 = vadd.f32 %v712_v21, %v694_v20  ;;  %v753_v24 = vpop.f32.mrf.mxu1  ;;  %929 = vmatmul.bf16.vlgmr.msrb.gmra.mxu3 %v767_v19  ;;  %v735_v28 = vadd.f32 %v734_v22, %v519_v3 }
 0x150   : > { %v760_v26 = vmax.f32 %v713_v23, 0.0  ;;  %v754_v32 = vadd.f32 %v753_v24, %v735_v28 }
 0x152   : > { %v766_v27 = vpack.c.bf16 %v760_v26, %v758_v25  ;;  %v763_v37 = vmax.f32 %v754_v32, 0.0 }
 0x153   : > { %v696_v29 = vpop.f32.mrf.mxu2 }
 0x154   : > { %v715_v30 = vpop.f32.mrf.mxu3  ;;  %910 = vmatmul.bf16.vlgmr.msrb.gmra.mxu2 %v766_v27  ;;  %v697_v35 = vadd.f32 %v696_v29, %v518_v7 }
 0x155   : > { %v736_v31 = vpop.f32.mrf.mxu0 }
 0x156   : > { %v737_v33 = vadd.f32 %v736_v31, %v519_v3  ;;  %v755_v34 = vpop.f32.mrf.mxu1  ;;  %v716_v40 = vadd.f32 %v715_v30, %v697_v35 }
 0x158   : > { %v756_v36 = vadd.f32 %v755_v34, %v737_v33  ;;  %v762_v45 = vmax.f32 %v716_v40, 0.0 }
 0x15a   : > { %v765_v38 = vmax.f32 %v756_v36, 0.0 }
 0x15b   : > { %v698_v39 = vpop.f32.mrf.mxu2 }
 0x15c   : > { %v699_v41 = vadd.f32 %v698_v39, %v518_v7  ;;  %v769_v42 = vpack.c.bf16 %v765_v38, %v763_v37  ;;  %v717_v43 = vpop.f32.mrf.mxu3 }
 0x15e   : > { %v718_v44 = vadd.f32 %v717_v43, %v699_v41  ;;  %934 = vmatmul.bf16.gmra.mxu3 %v769_v42 }
 0x160   : > { %v764_v46 = vmax.f32 %v718_v44, 0.0 }
 0x162   : > { %v768_v47 = vpack.c.bf16 %v764_v46, %v762_v45 }
 0x164   : > { %915 = vmatmul.bf16.gmra.mxu2 %v768_v47 }
 0x1d1   : > { %v930_v48 = vpop.f32.mrf.mxu3 }
 0x1d7   : > { %v911_v50 = vpop.f32.mrf.mxu2 }
 0x1d8   : > { %v912_v51 = vadd.f32 %v1400_v49, %v911_v50 }
 0x1d9   : > { %v932_v53 = vpop.f32.mrf.mxu3 }
 0x1da   : > { %v931_v52 = vadd.f32 %v930_v48, %v912_v51 }
 0x1dc   : > { %940 = vst [vmem:[%s314_s12] sm:$0xff] %v931_v52 }
 0x1df   : > { %v913_v54 = vpop.f32.mrf.mxu2 }
 0x1e0   : > { %v914_v55 = vadd.f32 %v1400_v49, %v913_v54 }
 0x1e1   : > { %v935_v57 = vpop.f32.mrf.mxu3 }
 0x1e2   : > { %v933_v56 = vadd.f32 %v932_v53, %v914_v55 }
 0x1e4   : > { %941 = vst [vmem:[%s314_s12 + $0x8] sm:$0xff] %v933_v56 }
 0x1e7   : > { %v916_v58 = vpop.f32.mrf.mxu2 }
 0x1e8   : > { %v917_v59 = vadd.f32 %v1400_v49, %v916_v58 }
 0x1e9   : > { %v937_v63 = vpop.f32.mrf.mxu3 }
 0x1ea   : > { %v936_v60 = vadd.f32 %v935_v57, %v917_v59 }
 0x1ec   : > { %942 = vst [vmem:[%s314_s12 + $0x10] sm:$0xff] %v936_v60 }
 0x1ef   : > { %v918_v61 = vpop.f32.mrf.mxu2 }
 0x1f0   : > { %v919_v62 = vadd.f32 %v1400_v49, %v918_v61 }
 0x1f2   : > { %v938_v0 = vadd.f32 %v937_v63, %v919_v62 }
 0x1f4   : > { %943 = vst [vmem:[%s314_s12 + $0x18] sm:$0xff] %v938_v0 }
 0x1f5 PF: > { %s19_s24 = sadd.s32 1, %s1475_s24  }
 0x1f6   : > { %p16_p7 = scmp.ge.s32.totalorder %s19_s24, 4  }
 0x1f8   :  { %18 = sbr.rel (!%p16_p7) target bundleno = 2 (0x2), region = 87 }
 0x1fd   :  { %966 = vsyncpa [#allocation3], 1 }
 0x1fe   :  { %968 = vsyncpa [#allocation3 + $0x1], 1 }
 0x1ff   :  { %969 = vsyncpa [#allocation5], 1 }

</bundles_post_ra>
